<compile_context>
chip_gen: v7x
topology: tpu7x:2x2x1
jax: 0.10.0
libtpu: 0.0.40
codegen_flags: <defaults>
</compile_context>

<pallas_src>
import functools

import jax
import jax.numpy as jnp
import numpy as np
from jax.experimental import pallas as pl
from jax.experimental.pallas import tpu as pltpu


def _edge_length_kernel(packed_ref, out_ref, *, n_chunks, chunk):
    """packed_ref: (1, 18, TF) block; out_ref: (1, 3, TF) block.

    Sublane-row layout of packed_ref (component-major, vertex-minor):
      rows 0..8  : prediction  [x_a, x_b, x_c, y_a, y_b, y_c, z_a, z_b, z_c]
      rows 9..17 : ground truth, same order
    """

    @pl.loop(0, n_chunks)
    def _(c):
        off = pl.multiple_of(c * chunk, chunk)
        # Load only a lane chunk at a time: keeps the live vreg set small
        # while the pipeline DMA still moves whole TF-wide tiles.
        p = packed_ref[:, :, pl.ds(off, chunk)].astype(jnp.float32)  # (1,18,chunk)

        def edge_len(base, i, j):
            # Explicit per-component math: stays on the VPU (no XLU sublane
            # reduce); single-row slices, never crossing an operand group.
            dx = p[:, base + i: base + i + 1, :] - p[:, base + j: base + j + 1, :]
            dy = (p[:, base + 3 + i: base + 3 + i + 1, :]
                  - p[:, base + 3 + j: base + 3 + j + 1, :])
            dz = (p[:, base + 6 + i: base + 6 + i + 1, :]
                  - p[:, base + 6 + j: base + 6 + j + 1, :])
            return jnp.sqrt(dx * dx + dy * dy + dz * dz)             # (1,1,chunk)

        d1 = jnp.abs(edge_len(0, 0, 1) - edge_len(9, 0, 1))
        d2 = jnp.abs(edge_len(0, 0, 2) - edge_len(9, 0, 2))
        d3 = jnp.abs(edge_len(0, 1, 2) - edge_len(9, 1, 2))
        # One stacked 3-row store per chunk (v5e has a single vst slot).
        out_ref[:, :, pl.ds(off, chunk)] = jnp.concatenate(
            [d1, d2, d3], axis=1).astype(out_ref.dtype)


def edge_length_loss(coord_out, coord_gt, face, *, max_face_tile=32768):
    """coord_out, coord_gt: (B, V, 3); face: (F, 3) int. Returns (B, 3*F, 1)."""
    B, V, C = coord_out.shape
    assert C == 3
    Fn = int(face.shape[0])

    # ---- balanced, 128-aligned face tiling --------------------------------
    max_tf = max(128, (int(max_face_tile) // 128) * 128)   # multiple of 128
    # Keep double-buffered in+out tiles <= ~16 MiB (safe on every generation's
    # scoped VMEM default without heroics).
    max_tf = min(max_tf, 64 * 1024)
    F128 = pl.cdiv(Fn, 128) * 128
    n_ftiles = pl.cdiv(F128, max_tf)
    if B == 1 and n_ftiles == 1 and F128 >= 256:
        n_ftiles = 2   # keep >= 2 parallel grid steps so both v7x TCs get work
    TF = pl.cdiv(pl.cdiv(F128, n_ftiles), 128) * 128
    F_pad = n_ftiles * TF

    # In-kernel lane-chunk size (always divides TF, TF is a multiple of 128).
    chunk = 512 if TF % 512 == 0 else (256 if TF % 256 == 0 else 128)
    n_chunks = TF // chunk

    # ---- pad the tiny index array (NOT the packed tensor) -----------------
    face = face.astype(jnp.int32)
    if F_pad != Fn:
        face = jnp.concatenate(
            [face, jnp.zeros((F_pad - Fn, 3), jnp.int32)], axis=0)
    idx = face.T.reshape(3 * F_pad)          # [a_0..a_F, b_0..b_F, c_0..c_F]

    # ---- ONE gather + ONE transpose per coordinate tensor ------------------
    def pack(coord):
        g = coord[:, idx, :]                                   # (B, 3*F_pad, 3)
        # (B, xyz, abc*F) -> (B, 9, F): rows [x_a,x_b,x_c, y_a,y_b,y_c, z_a,z_b,z_c]
        return jnp.transpose(g, (0, 2, 1)).reshape(B, 9, F_pad)

    packed = jnp.concatenate([pack(coord_out), pack(coord_gt)], axis=1)  # (B,18,F_pad)

    kernel = functools.partial(_edge_length_kernel, n_chunks=n_chunks, chunk=chunk)

    # Double-buffered input (18->24 padded sublanes) + output (3->8) tiles.
    vmem_bytes = 2 * (24 + 8) * TF * 4
    vmem_limit = int(min(max(2 * vmem_bytes, 32 * 1024 * 1024), 64 * 1024 * 1024))

    out = pl.pallas_call(
        kernel,
        out_shape=jax.ShapeDtypeStruct((B, 3, F_pad), coord_out.dtype),
        grid=(B, n_ftiles),
        in_specs=[pl.BlockSpec((1, 18, TF), lambda b, f: (b, 0, f))],
        out_specs=pl.BlockSpec((1, 3, TF), lambda b, f: (b, 0, f)),
        compiler_params=pltpu.CompilerParams(
            dimension_semantics=("parallel", "parallel"),
            vmem_limit_bytes=vmem_limit,
            allow_input_fusion=[True],   # let XLA fuse gather/transpose producer
        ),
    )(packed)

    # Drop face padding, then (B, 3, F) -> (B, 3*F, 1): rows are
    # [diff1 (F), diff2 (F), diff3 (F)] == torch.cat((diff1, diff2, diff3), 1).
    out = out[:, :, :Fn]
    return out.reshape(B, 3 * Fn, 1)


def _reference(coord_out, coord_gt, face):
    """Pure-JAX reference matching the PyTorch forward."""
    def d(c, i, j):
        diff = c[:, face[:, i], :] - c[:, face[:, j], :]
        return jnp.sqrt(jnp.sum(diff ** 2, axis=2, keepdims=True))

    diff1 = jnp.abs(d(coord_out, 0, 1) - d(coord_gt, 0, 1))
    diff2 = jnp.abs(d(coord_out, 0, 2) - d(coord_gt, 0, 2))
    diff3 = jnp.abs(d(coord_out, 1, 2) - d(coord_gt, 1, 2))
    return jnp.concatenate([diff1, diff2, diff3], axis=1)


if __name__ == "__main__":
    B, V, Fn = 2, 16, 8

    # Deterministic synthetic face connectivity (F, 3) with indices in [0, V).
    face = np.stack(
        [np.arange(Fn) % V,
         (np.arange(Fn) + 3) % V,
         (np.arange(Fn) + 7) % V],
        axis=1,
    ).astype(np.int32)
    face = jnp.asarray(face)

    key = jax.random.PRNGKey(0)
    k1, k2 = jax.random.split(key)
    coord_out = jax.random.normal(k1, (B, V, 3), dtype=jnp.float32)
    coord_gt = jax.random.normal(k2, (B, V, 3), dtype=jnp.float32)

    loss_fn = jax.jit(edge_length_loss)   # jit so the producer can fuse in
    loss = jax.block_until_ready(loss_fn(coord_out, coord_gt, face))

    ref = _reference(coord_out, coord_gt, face)
    assert loss.shape == (B, 3 * Fn, 1), loss.shape
    np.testing.assert_allclose(np.asarray(loss), np.asarray(ref),
                               rtol=1e-5, atol=1e-5)
    print("KERNEL_OK")
</pallas_src>

<mosaic_0001>
module attributes {stable_mosaic.version = 11 : i64} {
  func.func @_edge_length_kernel(%arg0: i32, %arg1: i32, %arg2: memref<1x18x128xf32, #tpu.memory_space<vmem>>, %arg3: memref<1x3x128xf32, #tpu.memory_space<vmem>>) attributes {dimension_semantics = [#tpu.dimension_semantics<parallel>, #tpu.dimension_semantics<parallel>], iteration_bounds = array<i64: 2, 1>, scalar_prefetch = 0 : i64, scratch_operands = 0 : i64, tpu.core_type = #tpu.core_type<tc>, window_params = [{transform_indices = @transform_0, window_bounds = array<i64: 1, 18, 128>}, {transform_indices = @transform_1, window_bounds = array<i64: 1, 3, 128>}]} {
    %c0_i32 = arith.constant 0 : i32
    %c1_i32 = arith.constant 1 : i32
    %0 = arith.muli %c0_i32, %c1_i32 : i32
    %c0_i32_0 = arith.constant 0 : i32
    %1 = arith.addi %c0_i32_0, %0 : i32
    %c128_i32 = arith.constant 128 : i32
    %2 = arith.muli %1, %c128_i32 : i32
    %3 = tpu.assume_multiple %2, 128 : i32
    %c0 = arith.constant 0 : index
    %c0_1 = arith.constant 0 : index
    %4 = arith.index_cast %3 : i32 to index
    %5 = vector.load %arg2[%c0, %c0_1, %4] : memref<1x18x128xf32, #tpu.memory_space<vmem>>, vector<1x18x128xf32>
    %6 = vector.extract_strided_slice %5 {offsets = [0, 0, 0], sizes = [1, 1, 128], strides = [1, 1, 1]} : vector<1x18x128xf32> to vector<1x1x128xf32>
    %7 = vector.extract_strided_slice %5 {offsets = [0, 1, 0], sizes = [1, 1, 128], strides = [1, 1, 1]} : vector<1x18x128xf32> to vector<1x1x128xf32>
    %8 = arith.subf %6, %7 : vector<1x1x128xf32>
    %9 = vector.extract_strided_slice %5 {offsets = [0, 3, 0], sizes = [1, 1, 128], strides = [1, 1, 1]} : vector<1x18x128xf32> to vector<1x1x128xf32>
    %10 = vector.extract_strided_slice %5 {offsets = [0, 4, 0], sizes = [1, 1, 128], strides = [1, 1, 1]} : vector<1x18x128xf32> to vector<1x1x128xf32>
    %11 = arith.subf %9, %10 : vector<1x1x128xf32>
    %12 = vector.extract_strided_slice %5 {offsets = [0, 6, 0], sizes = [1, 1, 128], strides = [1, 1, 1]} : vector<1x18x128xf32> to vector<1x1x128xf32>
    %13 = vector.extract_strided_slice %5 {offsets = [0, 7, 0], sizes = [1, 1, 128], strides = [1, 1, 1]} : vector<1x18x128xf32> to vector<1x1x128xf32>
    %14 = arith.subf %12, %13 : vector<1x1x128xf32>
    %15 = arith.mulf %8, %8 : vector<1x1x128xf32>
    %16 = arith.mulf %11, %11 : vector<1x1x128xf32>
    %17 = arith.addf %15, %16 : vector<1x1x128xf32>
    %18 = arith.mulf %14, %14 : vector<1x1x128xf32>
    %19 = arith.addf %17, %18 : vector<1x1x128xf32>
    %20 = math.sqrt %19 : vector<1x1x128xf32>
    %21 = vector.extract_strided_slice %5 {offsets = [0, 9, 0], sizes = [1, 1, 128], strides = [1, 1, 1]} : vector<1x18x128xf32> to vector<1x1x128xf32>
    %22 = vector.extract_strided_slice %5 {offsets = [0, 10, 0], sizes = [1, 1, 128], strides = [1, 1, 1]} : vector<1x18x128xf32> to vector<1x1x128xf32>
    %23 = arith.subf %21, %22 : vector<1x1x128xf32>
    %24 = vector.extract_strided_slice %5 {offsets = [0, 12, 0], sizes = [1, 1, 128], strides = [1, 1, 1]} : vector<1x18x128xf32> to vector<1x1x128xf32>
    %25 = vector.extract_strided_slice %5 {offsets = [0, 13, 0], sizes = [1, 1, 128], strides = [1, 1, 1]} : vector<1x18x128xf32> to vector<1x1x128xf32>
    %26 = arith.subf %24, %25 : vector<1x1x128xf32>
    %27 = vector.extract_strided_slice %5 {offsets = [0, 15, 0], sizes = [1, 1, 128], strides = [1, 1, 1]} : vector<1x18x128xf32> to vector<1x1x128xf32>
    %28 = vector.extract_strided_slice %5 {offsets = [0, 16, 0], sizes = [1, 1, 128], strides = [1, 1, 1]} : vector<1x18x128xf32> to vector<1x1x128xf32>
    %29 = arith.subf %27, %28 : vector<1x1x128xf32>
    %30 = arith.mulf %23, %23 : vector<1x1x128xf32>
    %31 = arith.mulf %26, %26 : vector<1x1x128xf32>
    %32 = arith.addf %30, %31 : vector<1x1x128xf32>
    %33 = arith.mulf %29, %29 : vector<1x1x128xf32>
    %34 = arith.addf %32, %33 : vector<1x1x128xf32>
    %35 = math.sqrt %34 : vector<1x1x128xf32>
    %36 = arith.subf %20, %35 : vector<1x1x128xf32>
    %37 = math.absf %36 : vector<1x1x128xf32>
    %38 = vector.extract_strided_slice %5 {offsets = [0, 0, 0], sizes = [1, 1, 128], strides = [1, 1, 1]} : vector<1x18x128xf32> to vector<1x1x128xf32>
    %39 = vector.extract_strided_slice %5 {offsets = [0, 2, 0], sizes = [1, 1, 128], strides = [1, 1, 1]} : vector<1x18x128xf32> to vector<1x1x128xf32>
    %40 = arith.subf %38, %39 : vector<1x1x128xf32>
    %41 = vector.extract_strided_slice %5 {offsets = [0, 3, 0], sizes = [1, 1, 128], strides = [1, 1, 1]} : vector<1x18x128xf32> to vector<1x1x128xf32>
    %42 = vector.extract_strided_slice %5 {offsets = [0, 5, 0], sizes = [1, 1, 128], strides = [1, 1, 1]} : vector<1x18x128xf32> to vector<1x1x128xf32>
    %43 = arith.subf %41, %42 : vector<1x1x128xf32>
    %44 = vector.extract_strided_slice %5 {offsets = [0, 6, 0], sizes = [1, 1, 128], strides = [1, 1, 1]} : vector<1x18x128xf32> to vector<1x1x128xf32>
    %45 = vector.extract_strided_slice %5 {offsets = [0, 8, 0], sizes = [1, 1, 128], strides = [1, 1, 1]} : vector<1x18x128xf32> to vector<1x1x128xf32>
    %46 = arith.subf %44, %45 : vector<1x1x128xf32>
    %47 = arith.mulf %40, %40 : vector<1x1x128xf32>
    %48 = arith.mulf %43, %43 : vector<1x1x128xf32>
    %49 = arith.addf %47, %48 : vector<1x1x128xf32>
    %50 = arith.mulf %46, %46 : vector<1x1x128xf32>
    %51 = arith.addf %49, %50 : vector<1x1x128xf32>
    %52 = math.sqrt %51 : vector<1x1x128xf32>
    %53 = vector.extract_strided_slice %5 {offsets = [0, 9, 0], sizes = [1, 1, 128], strides = [1, 1, 1]} : vector<1x18x128xf32> to vector<1x1x128xf32>
    %54 = vector.extract_strided_slice %5 {offsets = [0, 11, 0], sizes = [1, 1, 128], strides = [1, 1, 1]} : vector<1x18x128xf32> to vector<1x1x128xf32>
    %55 = arith.subf %53, %54 : vector<1x1x128xf32>
    %56 = vector.extract_strided_slice %5 {offsets = [0, 12, 0], sizes = [1, 1, 128], strides = [1, 1, 1]} : vector<1x18x128xf32> to vector<1x1x128xf32>
    %57 = vector.extract_strided_slice %5 {offsets = [0, 14, 0], sizes = [1, 1, 128], strides = [1, 1, 1]} : vector<1x18x128xf32> to vector<1x1x128xf32>
    %58 = arith.subf %56, %57 : vector<1x1x128xf32>
    %59 = vector.extract_strided_slice %5 {offsets = [0, 15, 0], sizes = [1, 1, 128], strides = [1, 1, 1]} : vector<1x18x128xf32> to vector<1x1x128xf32>
    %60 = vector.extract_strided_slice %5 {offsets = [0, 17, 0], sizes = [1, 1, 128], strides = [1, 1, 1]} : vector<1x18x128xf32> to vector<1x1x128xf32>
    %61 = arith.subf %59, %60 : vector<1x1x128xf32>
    %62 = arith.mulf %55, %55 : vector<1x1x128xf32>
    %63 = arith.mulf %58, %58 : vector<1x1x128xf32>
    %64 = arith.addf %62, %63 : vector<1x1x128xf32>
    %65 = arith.mulf %61, %61 : vector<1x1x128xf32>
    %66 = arith.addf %64, %65 : vector<1x1x128xf32>
    %67 = math.sqrt %66 : vector<1x1x128xf32>
    %68 = arith.subf %52, %67 : vector<1x1x128xf32>
    %69 = math.absf %68 : vector<1x1x128xf32>
    %70 = vector.extract_strided_slice %5 {offsets = [0, 1, 0], sizes = [1, 1, 128], strides = [1, 1, 1]} : vector<1x18x128xf32> to vector<1x1x128xf32>
    %71 = vector.extract_strided_slice %5 {offsets = [0, 2, 0], sizes = [1, 1, 128], strides = [1, 1, 1]} : vector<1x18x128xf32> to vector<1x1x128xf32>
    %72 = arith.subf %70, %71 : vector<1x1x128xf32>
    %73 = vector.extract_strided_slice %5 {offsets = [0, 4, 0], sizes = [1, 1, 128], strides = [1, 1, 1]} : vector<1x18x128xf32> to vector<1x1x128xf32>
    %74 = vector.extract_strided_slice %5 {offsets = [0, 5, 0], sizes = [1, 1, 128], strides = [1, 1, 1]} : vector<1x18x128xf32> to vector<1x1x128xf32>
    %75 = arith.subf %73, %74 : vector<1x1x128xf32>
    %76 = vector.extract_strided_slice %5 {offsets = [0, 7, 0], sizes = [1, 1, 128], strides = [1, 1, 1]} : vector<1x18x128xf32> to vector<1x1x128xf32>
    %77 = vector.extract_strided_slice %5 {offsets = [0, 8, 0], sizes = [1, 1, 128], strides = [1, 1, 1]} : vector<1x18x128xf32> to vector<1x1x128xf32>
    %78 = arith.subf %76, %77 : vector<1x1x128xf32>
    %79 = arith.mulf %72, %72 : vector<1x1x128xf32>
    %80 = arith.mulf %75, %75 : vector<1x1x128xf32>
    %81 = arith.addf %79, %80 : vector<1x1x128xf32>
    %82 = arith.mulf %78, %78 : vector<1x1x128xf32>
    %83 = arith.addf %81, %82 : vector<1x1x128xf32>
    %84 = math.sqrt %83 : vector<1x1x128xf32>
    %85 = vector.extract_strided_slice %5 {offsets = [0, 10, 0], sizes = [1, 1, 128], strides = [1, 1, 1]} : vector<1x18x128xf32> to vector<1x1x128xf32>
    %86 = vector.extract_strided_slice %5 {offsets = [0, 11, 0], sizes = [1, 1, 128], strides = [1, 1, 1]} : vector<1x18x128xf32> to vector<1x1x128xf32>
    %87 = arith.subf %85, %86 : vector<1x1x128xf32>
    %88 = vector.extract_strided_slice %5 {offsets = [0, 13, 0], sizes = [1, 1, 128], strides = [1, 1, 1]} : vector<1x18x128xf32> to vector<1x1x128xf32>
    %89 = vector.extract_strided_slice %5 {offsets = [0, 14, 0], sizes = [1, 1, 128], strides = [1, 1, 1]} : vector<1x18x128xf32> to vector<1x1x128xf32>
    %90 = arith.subf %88, %89 : vector<1x1x128xf32>
    %91 = vector.extract_strided_slice %5 {offsets = [0, 16, 0], sizes = [1, 1, 128], strides = [1, 1, 1]} : vector<1x18x128xf32> to vector<1x1x128xf32>
    %92 = vector.extract_strided_slice %5 {offsets = [0, 17, 0], sizes = [1, 1, 128], strides = [1, 1, 1]} : vector<1x18x128xf32> to vector<1x1x128xf32>
    %93 = arith.subf %91, %92 : vector<1x1x128xf32>
    %94 = arith.mulf %87, %87 : vector<1x1x128xf32>
    %95 = arith.mulf %90, %90 : vector<1x1x128xf32>
    %96 = arith.addf %94, %95 : vector<1x1x128xf32>
    %97 = arith.mulf %93, %93 : vector<1x1x128xf32>
    %98 = arith.addf %96, %97 : vector<1x1x128xf32>
    %99 = math.sqrt %98 : vector<1x1x128xf32>
    %100 = arith.subf %84, %99 : vector<1x1x128xf32>
    %101 = math.absf %100 : vector<1x1x128xf32>
    %102 = tpu.concatenate %37, %69, %101 in 1 : vector<1x1x128xf32>, vector<1x1x128xf32>, vector<1x1x128xf32> -> vector<1x3x128xf32>
    %c0_2 = arith.constant 0 : index
    %c0_3 = arith.constant 0 : index
    %103 = arith.index_cast %3 : i32 to index
    %104 = vector.load %arg3[%c0_2, %c0_3, %103] : memref<1x3x128xf32, #tpu.memory_space<vmem>>, vector<1x3x128xf32>
    tpu.vector_store %arg3[%c0_2, %c0_3, %103], %102 {strides = array<i32>} : memref<1x3x128xf32, #tpu.memory_space<vmem>>, vector<1x3x128xf32>,
    %c1_i32_4 = arith.constant 1 : i32
    return
  }
  func.func @transform_0(%arg0: i32, %arg1: i32) -> (i32, i32, i32) {
    %c0_i32 = arith.constant 0 : i32
    %c0_i32_0 = arith.constant 0 : i32
    return %arg0, %c0_i32, %arg1 : i32, i32, i32
  }
  func.func @transform_1(%arg0: i32, %arg1: i32) -> (i32, i32, i32) {
    %c0_i32 = arith.constant 0 : i32
    %c0_i32_0 = arith.constant 0 : i32
    return %arg0, %c0_i32, %arg1 : i32, i32, i32
  }
}

</mosaic_0001>

<bundles_post_ra>
// kernel: edge_length_loss.2
= control target key start
LH: loop header
LB: loop body
LE: loop exit
PB: predicated region body
PF: predicated region fallthrough
CT: control target
= control target key end

     0   :  { %s610_s14 = smov 0   ;;  %s612_s15 = smov 0   ;;  %s680_s0 = inlined_call_operand.vmem [shape: f32[2,9,128], index: 0, kind: input, shape index: {}]   ;;  %s681_s1 = inlined_call_operand.<no memory space> [shape: f32[], index: 1, kind: input, shape index: {}]   ;;  %s682_s2 = inlined_call_operand.vmem [shape: f32[2,9,128], index: 2, kind: input, shape index: {}]   ;;  %s683_s3 = inlined_call_operand.vmem [shape: f32[2,3,128], index: 3, kind: output, shape index: {}]  }
   0x1   :  { %v608_v0 = vstv %s681_s1  ;;  %s614_s16 = smov 0  }
   0x2 LB: > { %s27_s1 = sadd.s32 1, %s579_s15  ;;  %p511_p0 = scmp.ge.s32.totalorder %s583_s16, 1  ;;  %s583_s16 = sphi %s614_s16, %s15_s16   ;;  %s579_s15 = sphi %s612_s15, %s685_s15   ;;  %s575_s14 = sphi %s610_s14, %s684_s14  }
   0x3   : > { %p29_p1 = scmp.ge.s32.totalorder %s27_s1, 2  ;;  %p150_p2 = scmp.lt.s32.totalorder %s583_s16, 3 }
   0x5   : > { %s687_s1 = smov (%p29_p1, %s27_s1), 0  ;;  %p151_p3 = pnand %p511_p0, %p150_p2 }
   0x7   : > { %154 = sbr.rel (%p151_p3) target bundleno = 72 (0x48), region = 28 }
   0xe   : > { %p186_p4 = scmp.lt.s32.totalorder %s575_s14, 1  ;;  %v235_v1 = vlaneseq  ;;  %vm230_vm0 = vcmask 1046528   ;;  %vm402_vm15 = vcmask 1040384  }
  0x10   : > { %s689_s14 = smov (!%p186_p4, %s575_s14), 1  ;;  %v236_v2 = vshrl.u32 %v235_v1, 7 }
  0x11   : > { %s523_s17 = sshll.u32 %s689_s14, 4  ;;  %s516_s24 = sshll.u32 %s689_s14, 2 }
  0x12   : > { %v237_v3 = vadd.s32 8, %v236_v2  ;;  %v251_v4 = vadd.s32 24, %v236_v2  ;;  %s456_s20 = scalar_lea.vmem %s680_s0, %s523_s17  ;;  %s202_s23 = scalar_lea.vmem %s682_s2, %s523_s17 }
  0x13   : > { %v211_v5 = vld [vmem:[%s202_s23] sm:$0xff]  ;;  %v519_v7 = vld [vmem:[%s202_s23 + $0x8] sm:$0xff]  ;;  %s209_s27 = scalar_lea.vmem %s683_s3, %s516_s24 }
  0x14   : > { %v518_v6 = vld [vmem:[%s456_s20] sm:$0xff]  ;;  %vm238_vm1 = vcmp.lt.s32.totalorder %v237_v3, 9  ;;  %vm252_vm2 = vcmp.lt.s32.totalorder %v251_v4, 25  ;;  %v219_v8 = vmax.f32 %v211_v5, %v608_v0  ;;  %v520_v11 = vld [vmem:[%s456_s20 + $0x8] sm:$0xff] }
  0x15   : > { %v231_v9 = vsel %vm230_vm0, %v518_v6, %v608_v0  ;;  %v239_v10 = vsel %vm238_vm1, %v519_v7, %v608_v0  ;;  %v253_v13 = vsel %vm252_vm2, %v520_v11, %v608_v0 }
  0x16   : > { %v232_v12 = vrot.slane %v231_v9, 7  ;;  %v255_v14 = vsel %vm230_vm0, %v253_v13, %v518_v6  ;;  %v268_v15 = vrot.slane %v219_v8, 1  ;;  %v316_v16 = vrot.slane %v219_v8, 2 }
  0x17   : > { %v256_v18 = vrot.slane %v255_v14, 7  ;;  %vm404_vm0 = vcmask 1041408  }
  0x18   : > { %v242_v17 = vmax.f32 %v239_v10, %v232_v12  ;;  %v270_v19 = vsub.f32 %v219_v8, %v268_v15  ;;  %v318_v20 = vsub.f32 %v219_v8, %v316_v16 }
  0x19   : > { %v259_v21 = vmax.f32 %v608_v0, %v256_v18 }
  0x1a   : > { %v287_v22 = vrot.slane %v242_v17, 1  ;;  %v319_v23 = vrot.slane %v242_v17, 2  ;;  %v271_v24 = vmul.f32 %v270_v19, %v270_v19  ;;  %v322_v25 = vmul.f32 %v318_v20, %v318_v20 }
  0x1b   : > { %263 = vst [vmem:[#allocation12 + $0x10] sm:$0xff] %v259_v21 }
  0x1c   : > { %v289_v26 = vsub.f32 %v242_v17, %v287_v22  ;;  %v321_v27 = vsub.f32 %v219_v8, %v319_v23  ;;  %v365_v28 = vsub.f32 %v219_v8, %v287_v22  ;;  %v273_v29 = vrot.slane %v271_v24, 3 }
  0x1d   : > { %v324_v30 = vrot.slane %v322_v25, 3  ;;  %v339_v31 = vsub.f32 %v242_v17, %v319_v23  ;;  %v276_v32 = vrot.slane %v271_v24, 6 }
  0x1e   : > { %v327_v33 = vmul.f32 %v321_v27, %v321_v27  ;;  %v366_v34 = vmul.f32 %v365_v28, %v365_v28  ;;  %v275_v35 = vadd.f32 %v273_v29, %v271_v24  ;;  %v294_v36 = vmul.f32 %v289_v26, %v289_v26 }
  0x1f   : > { %v326_v37 = vadd.f32 %v324_v30, %v322_v25  ;;  %v343_v39 = vmul.f32 %v339_v31, %v339_v31 }
  0x20   : > { %v329_v38 = vrot.slane %v327_v33, 6  ;;  %v278_v40 = vadd.f32 %v276_v32, %v275_v35  ;;  %v368_v41 = vrot.slane %v366_v34, 6  ;;  %v296_v44 = vrot.slane %v294_v36, 3 }
  0x21   : > { %v345_v47 = vrot.slane %v343_v39, 3 }
  0x22   : > { %v266_v42 = vld [vmem:[#allocation12 + $0x10] sm:$0x3]  ;;  %v642_v45 = vadd.f32 %v329_v38, %v326_v37  ;;  %549 = vrsqrt.f32 %v278_v40  ;;  %v644_v49 = vadd.f32 %v368_v41, %v275_v35  ;;  %v298_v52 = vadd.f32 %v296_v44, %v294_v36 }
  0x23   : > { %v291_v43 = vrot.slane %v266_v42, 1  ;;  %v340_v46 = vrot.slane %v266_v42, 2  ;;  %v347_v55 = vadd.f32 %v345_v47, %v343_v39  ;;  %vm281_vm3 = vcmp.eq.f32.partialorder %v278_v40, inf }
  0x24   : > { %551 = vrsqrt.f32 %v642_v45  ;;  %vm283_vm4 = vcmp.eq.f32.partialorder %v278_v40, 0.0  ;;  %v284_v4 = vand.u32 2147483648, %v278_v40  ;;  %vm334_vm5 = vcmp.eq.f32.partialorder %v642_v45, inf }
  0x25   : > { %v293_v48 = vsub.f32 %v242_v17, %v291_v43  ;;  %v378_v50 = vsub.f32 %v266_v42, %v291_v43  ;;  %v342_v51 = vsub.f32 %v242_v17, %v340_v46  ;;  %553 = vrsqrt.f32 %v644_v49 }
  0x26   : > { %vm336_vm6 = vcmp.eq.f32.partialorder %v642_v45, 0.0  ;;  %v337_v7 = vand.u32 2147483648, %v642_v45  ;;  %vm373_vm7 = vcmp.eq.f32.partialorder %v644_v49, inf  ;;  %vm375_vm9 = vcmp.eq.f32.partialorder %v644_v49, 0.0 }
  0x27   : > { %v299_v53 = vmul.f32 %v293_v48, %v293_v48  ;;  %v379_v54 = vmul.f32 %v378_v50, %v378_v50  ;;  %v348_v56 = vmul.f32 %v342_v51, %v342_v51  ;;  %v376_v11 = vand.u32 2147483648, %v644_v49 }
  0x29   : > { %v301_v57 = vrot.slane %v299_v53, 6  ;;  %v381_v58 = vrot.slane %v379_v54, 6  ;;  %v350_v59 = vrot.slane %v348_v56, 6 }
  0x2b   : > { %v303_v60 = vadd.f32 %v301_v57, %v298_v52  ;;  %v352_v61 = vadd.f32 %v350_v59, %v347_v55  ;;  %v383_v62 = vadd.f32 %v381_v58, %v298_v52 }
  0x2c   : > { %v550_v63 = vpop.eup %549 }
  0x2d   : > { %555 = vrsqrt.f32 %v303_v60  ;;  %v280_v2 = vmul.f32 %v550_v63, %v278_v40  ;;  %vm306_vm8 = vcmp.eq.f32.partialorder %v303_v60, inf  ;;  %v309_v10 = vand.u32 2147483648, %v303_v60 }
  0x2e   : > { %557 = vrsqrt.f32 %v352_v61  ;;  %v552_v1 = vpop.eup %551  ;;  %vm308_vm10 = vcmp.eq.f32.partialorder %v303_v60, 0.0  ;;  %vm355_vm11 = vcmp.eq.f32.partialorder %v352_v61, inf  ;;  %v358_v14 = vand.u32 2147483648, %v352_v61 }
  0x2f   : > { %559 = vrsqrt.f32 %v383_v62  ;;  %v554_v3 = vpop.eup %553  ;;  %v333_v5 = vmul.f32 %v552_v1, %v642_v45  ;;  %v282_v6 = vsel %vm281_vm3, %v278_v40, %v280_v2  ;;  %vm357_vm12 = vcmp.eq.f32.partialorder %v352_v61, 0.0 }
  0x30   : > { %v372_v8 = vmul.f32 %v554_v3, %v644_v49  ;;  %v285_v15 = vsel %vm283_vm4, %v284_v4, %v282_v6  ;;  %vm386_vm13 = vcmp.eq.f32.partialorder %v383_v62, inf  ;;  %v389_v21 = vand.u32 2147483648, %v383_v62 }
  0x31   : > { %v335_v16 = vsel %vm334_vm5, %v642_v45, %v333_v5  ;;  %vm388_vm14 = vcmp.eq.f32.partialorder %v383_v62, 0.0 }
  0x32   : > { %v374_v20 = vsel %vm373_vm7, %v644_v49, %v372_v8  ;;  %v338_v26 = vsel %vm336_vm6, %v337_v7, %v335_v16 }
  0x33   : > { %v377_v31 = vsel %vm375_vm9, %v376_v11, %v374_v20 }
  0x37   : > { %v556_v9 = vpop.eup %555 }
  0x38   : > { %v558_v12 = vpop.eup %557  ;;  %v305_v13 = vmul.f32 %v556_v9, %v303_v60 }
  0x39   : > { %v354_v17 = vmul.f32 %v558_v12, %v352_v61  ;;  %v560_v18 = vpop.eup %559 }
  0x3a   : > { %v307_v19 = vsel %vm306_vm8, %v303_v60, %v305_v13  ;;  %v385_v24 = vmul.f32 %v560_v18, %v383_v62 }
  0x3b   : > { %v310_v22 = vsel %vm308_vm10, %v309_v10, %v307_v19  ;;  %v356_v23 = vsel %vm355_vm11, %v352_v61, %v354_v17 }
  0x3c   : > { %v312_v25 = vrot.slane %v310_v22, 1  ;;  %v359_v27 = vsel %vm357_vm12, %v358_v14, %v356_v23  ;;  %v387_v29 = vsel %vm386_vm13, %v383_v62, %v385_v24 }
  0x3d   : > { %v361_v28 = vrot.slane %v359_v27, 1  ;;  %v390_v32 = vsel %vm388_vm14, %v389_v21, %v387_v29 }
  0x3e   : > { %v314_v30 = vsub.f32 %v285_v15, %v312_v25  ;;  %v392_v34 = vrot.slane %v390_v32, 1 }
  0x3f   : > { %v363_v33 = vsub.f32 %v338_v26, %v361_v28 }
  0x40   : > { %v315_v35 = vand.u32 2147483647, %v314_v30  ;;  %v394_v37 = vsub.f32 %v377_v31, %v392_v34 }
  0x41   : > { %v364_v36 = vand.u32 2147483647, %v363_v33 }
  0x42   : > { %v395_v38 = vand.u32 2147483647, %v394_v37 }
  0x43   : > { %v397_v39 = vrot.slane %v364_v36, 7 }
  0x44   : > { %v400_v40 = vrot.slane %v395_v38, 7 }
  0x45   : > { %v403_v41 = vsel %vm402_vm15, %v315_v35, %v397_v39 }
  0x46   : > { %v405_v42 = vsel %vm404_vm0, %v403_v41, %v400_v40 }
  0x47   : > { %406 = vst [vmem:[%s209_s27] sm:$0x7] %v405_v42 }
  0x48 PF: > { %s15_s16 = sadd.s32 1, %s583_s16   ;;  %s684_s14 = smov %s579_s15 }
  0x49   : > { %p12_p5 = scmp.ge.s32.totalorder %s15_s16, 4   ;;  %s685_s15 = smov %s687_s1 }
  0x4b   :  { %14 = sbr.rel (!%p12_p5) target bundleno = 2 (0x2), region = 67 }

</bundles_post_ra>
